<compile_context>
chip_gen: v7x
topology: tpu7x:2x2x1
jax: 0.10.0
libtpu: 0.0.40
codegen_flags: <defaults>
</compile_context>

<pallas_src>
import functools

import jax
import jax.numpy as jnp
from jax.experimental import pallas as pl
from jax.experimental.pallas import tpu as pltpu

_VMEM_LIMIT = 48 * 1024 * 1024  # safe on v5e/v6e/v7x; raise further on v6e if tiles grow


# ----------------------------- linear (matmul + bias) -----------------------------

def _linear_kernel(x_ref, w_ref, b_ref, o_ref, acc_ref):
    k = pl.program_id(2)

    @pl.when(k == 0)
    def _():
        acc_ref[...] = jnp.zeros_like(acc_ref)

    acc_ref[...] += jnp.dot(x_ref[...], w_ref[...],
                            preferred_element_type=jnp.float32)

    @pl.when(k == pl.num_programs(2) - 1)
    def _():
        o_ref[...] = (acc_ref[...] + b_ref[...].astype(jnp.float32)).astype(o_ref.dtype)


def linear(x, w, b, *, tm=256, tn=512, tk=512):
    """x: [T, K]; w: [K, N]; b: [1, N] -> [T, N]."""
    T, K = x.shape
    N = w.shape[1]
    tm, tn, tk = min(tm, T), min(tn, N), min(tk, K)
    # TODO(synk): pad / mask tails for shapes not divisible by the tile sizes.
    assert T % tm == 0 and N % tn == 0 and K % tk == 0
    grid = (T // tm, N // tn, K // tk)
    flops = 2 * T * K * N
    bytes_accessed = (T * K + K * N + T * N + N) * x.dtype.itemsize
    return pl.pallas_call(
        _linear_kernel,
        out_shape=jax.ShapeDtypeStruct((T, N), x.dtype),
        grid_spec=pltpu.PrefetchScalarGridSpec(
            num_scalar_prefetch=0,
            grid=grid,
            in_specs=[
                pl.BlockSpec((tm, tk), lambda i, j, k: (i, k)),   # activations
                pl.BlockSpec((tk, tn), lambda i, j, k: (k, j)),   # weight slab
                pl.BlockSpec((1, tn), lambda i, j, k: (0, j)),    # bias row
            ],
            out_specs=pl.BlockSpec((tm, tn), lambda i, j, k: (i, j)),
            scratch_shapes=[pltpu.VMEM((tm, tn), jnp.float32)],
        ),
        compiler_params=pltpu.CompilerParams(
            dimension_semantics=("parallel", "parallel", "arbitrary"),
            vmem_limit_bytes=_VMEM_LIMIT),
        cost_estimate=pl.CostEstimate(flops=flops, transcendentals=0,
                                      bytes_accessed=bytes_accessed),
    )(x, w, b)


# ----------------------------------- RoPE -----------------------------------------

def _rope_kernel(x_ref, cos_ref, sin_ref, o_ref):
    x = x_ref[...].astype(jnp.float32)          # [1, tm, hd]
    cos = cos_ref[...][None, :, :]              # [1, tm, hd]
    sin = sin_ref[...][None, :, :]
    half = x.shape[-1] // 2
    x1 = x[..., :half]
    x2 = x[..., half:]
    rotated = jnp.concatenate([-x2, x1], axis=-1)
    o_ref[...] = (x * cos + rotated * sin).astype(o_ref.dtype)


def apply_rope(x_hld, cos_full, sin_full, *, tm=128):
    """x_hld: [n_heads, T, head_dim]; cos/sin_full: [T, head_dim] (halves concatenated)."""
    nh, T, hd = x_hld.shape
    tm = min(tm, T)
    assert T % tm == 0
    grid = (nh, T // tm)
    return pl.pallas_call(
        _rope_kernel,
        out_shape=jax.ShapeDtypeStruct((nh, T, hd), x_hld.dtype),
        grid_spec=pltpu.PrefetchScalarGridSpec(
            num_scalar_prefetch=0,
            grid=grid,
            in_specs=[
                pl.BlockSpec((1, tm, hd), lambda h, i: (h, i, 0)),
                pl.BlockSpec((tm, hd), lambda h, i: (i, 0)),
                pl.BlockSpec((tm, hd), lambda h, i: (i, 0)),
            ],
            out_specs=pl.BlockSpec((1, tm, hd), lambda h, i: (h, i, 0)),
        ),
        compiler_params=pltpu.CompilerParams(
            dimension_semantics=("parallel", "parallel")),
    )(x_hld, cos_full, sin_full)


# ------------------------- causal flash attention (GQA) ---------------------------

def _flash_attn_kernel(q_ref, k_ref, v_ref, o_ref, m_sc, l_sc, acc_sc, *, scale):
    qi = pl.program_id(1)
    ki = pl.program_id(2)
    tq = q_ref.shape[1]
    tk = k_ref.shape[1]

    @pl.when(ki == 0)
    def _():
        m_sc[...] = jnp.full_like(m_sc, -1e30)
        l_sc[...] = jnp.zeros_like(l_sc)
        acc_sc[...] = jnp.zeros_like(acc_sc)

    q_start = qi * tq
    k_start = ki * tk

    # Skip KV tiles that are entirely in the (masked) future of this Q tile.
    @pl.when(k_start < q_start + tq)
    def _():
        q = q_ref[...].astype(jnp.float32) * scale          # [1, tq, hd]
        k = k_ref[...].astype(jnp.float32)                  # [1, tk, hd]
        s = jnp.einsum('bqd,bkd->bqk', q, k,
                       preferred_element_type=jnp.float32)  # [1, tq, tk]
        row = q_start + jax.lax.broadcasted_iota(jnp.int32, s.shape, 1)
        col = k_start + jax.lax.broadcasted_iota(jnp.int32, s.shape, 2)
        s = jnp.where(row >= col, s, -1e30)

        m_prev = m_sc[...]
        m_new = jnp.maximum(m_prev, s.max(axis=-1, keepdims=True))
        alpha = jnp.exp(m_prev - m_new)
        p = jnp.exp(s - m_new)
        l_sc[...] = alpha * l_sc[...] + p.sum(axis=-1, keepdims=True)
        acc_sc[...] = alpha * acc_sc[...] + jnp.einsum(
            'bqk,bkd->bqd', p, v_ref[...].astype(jnp.float32),
            preferred_element_type=jnp.float32)
        m_sc[...] = m_new

    @pl.when(ki == pl.num_programs(2) - 1)
    def _():
        o_ref[...] = (acc_sc[...] *
                      pl.reciprocal(l_sc[...], approx=True)).astype(o_ref.dtype)


def flash_attention(q, k, v, *, scale, tq=128, tk=128):
    """q: [nh, T, hd]; k, v: [nkv, T, hd] -> [nh, T, hd]. Causal, GQA head sharing."""
    nh, T, hd = q.shape
    nkv = k.shape[0]
    assert nh % nkv == 0
    group = nh // nkv
    tq, tk = min(tq, T), min(tk, T)
    assert T % tq == 0 and T % tk == 0
    grid = (nh, T // tq, T // tk)
    kernel = functools.partial(_flash_attn_kernel, scale=scale)
    return pl.pallas_call(
        kernel,
        out_shape=jax.ShapeDtypeStruct((nh, T, hd), q.dtype),
        grid_spec=pltpu.PrefetchScalarGridSpec(
            num_scalar_prefetch=0,
            grid=grid,
            in_specs=[
                pl.BlockSpec((1, tq, hd), lambda h, qi, ki: (h, qi, 0)),
                pl.BlockSpec((1, tk, hd), lambda h, qi, ki: (h // group, ki, 0)),
                pl.BlockSpec((1, tk, hd), lambda h, qi, ki: (h // group, ki, 0)),
            ],
            out_specs=pl.BlockSpec((1, tq, hd), lambda h, qi, ki: (h, qi, 0)),
            scratch_shapes=[
                pltpu.VMEM((1, tq, 1), jnp.float32),   # running max
                pltpu.VMEM((1, tq, 1), jnp.float32),   # running denom
                pltpu.VMEM((1, tq, hd), jnp.float32),  # output accumulator
            ],
        ),
        compiler_params=pltpu.CompilerParams(
            dimension_semantics=("parallel", "parallel", "arbitrary"),
            vmem_limit_bytes=_VMEM_LIMIT),
    )(q, k, v)


# ----------------------------- Qwen2Attention forward -----------------------------

def qwen2_attention(positions, hidden_states, w_qkv, b_qkv, w_o, *,
                    num_heads, num_kv_heads, head_dim, rope_theta=10000.0):
    """positions: [T] int32; hidden_states: [T, H] -> [T, H]."""
    T, H = hidden_states.shape
    q_size = num_heads * head_dim
    kv_size = num_kv_heads * head_dim
    scale = head_dim ** -0.5

    # Fused QKV projection with bias (single weight stream / single MXU pass).
    qkv = linear(hidden_states, w_qkv, b_qkv.reshape(1, -1))

    q = qkv[:, :q_size].reshape(T, num_heads, head_dim).transpose(1, 0, 2)
    k = qkv[:, q_size:q_size + kv_size].reshape(T, num_kv_heads, head_dim).transpose(1, 0, 2)
    v = qkv[:, q_size + kv_size:].reshape(T, num_kv_heads, head_dim).transpose(1, 0, 2)

    # Rotary tables (neox-style rotate-half), computed once in the wrapper.
    inv_freq = 1.0 / (rope_theta ** (jnp.arange(0, head_dim, 2, dtype=jnp.float32) / head_dim))
    freqs = positions.astype(jnp.float32)[:, None] * inv_freq[None, :]       # [T, hd/2]
    cos = jnp.concatenate([jnp.cos(freqs), jnp.cos(freqs)], axis=-1)         # [T, hd]
    sin = jnp.concatenate([jnp.sin(freqs), jnp.sin(freqs)], axis=-1)

    q = apply_rope(q, cos, sin)
    k = apply_rope(k, cos, sin)

    # Causal GQA attention (prefill path over the current sequence).
    # TODO(synk): paged KV-cache write/read and InputMetadata-driven decode path
    # (vLLM Attention backend) are not implemented here.
    attn = flash_attention(q, k, v, scale=scale)                             # [nh, T, hd]
    attn = attn.transpose(1, 0, 2).reshape(T, q_size)

    # Output projection (o_proj has no bias in Qwen2).
    # TODO(synk): tensor-parallel all-reduce of RowParallelLinear is omitted (tp=1).
    zero_b = jnp.zeros((1, H), dtype=hidden_states.dtype)
    return linear(attn, w_o, zero_b)


# ----------------------------------- reference -------------------------------------

def _reference(positions, x, w_qkv, b_qkv, w_o, *, num_heads, num_kv_heads,
               head_dim, rope_theta):
    T, H = x.shape
    q_size = num_heads * head_dim
    kv_size = num_kv_heads * head_dim
    qkv = x @ w_qkv + b_qkv
    q = qkv[:, :q_size]
    k = qkv[:, q_size:q_size + kv_size]
    v = qkv[:, q_size + kv_size:]

    half = head_dim // 2
    inv_freq = 1.0 / (rope_theta ** (jnp.arange(0, head_dim, 2, dtype=jnp.float32) / head_dim))
    freqs = positions.astype(jnp.float32)[:, None] * inv_freq[None, :]
    cos = jnp.concatenate([jnp.cos(freqs)] * 2, -1)[:, None, :]
    sin = jnp.concatenate([jnp.sin(freqs)] * 2, -1)[:, None, :]

    def rope(t, n):
        t = t.reshape(T, n, head_dim)
        rot = jnp.concatenate([-t[..., half:], t[..., :half]], -1)
        return (t * cos + rot * sin).reshape(T, n * head_dim)

    q = rope(q, num_heads)
    k = rope(k, num_kv_heads)

    qh = q.reshape(T, num_heads, head_dim).transpose(1, 0, 2)
    kh = k.reshape(T, num_kv_heads, head_dim).transpose(1, 0, 2)
    vh = v.reshape(T, num_kv_heads, head_dim).transpose(1, 0, 2)
    group = num_heads // num_kv_heads
    kh = jnp.repeat(kh, group, axis=0)
    vh = jnp.repeat(vh, group, axis=0)

    s = jnp.einsum('hqd,hkd->hqk', qh, kh) * head_dim ** -0.5
    mask = jnp.tril(jnp.ones((T, T), dtype=bool))
    s = jnp.where(mask[None], s, -jnp.inf)
    p = jax.nn.softmax(s, axis=-1)
    o = jnp.einsum('hqk,hkd->hqd', p, vh)
    o = o.transpose(1, 0, 2).reshape(T, q_size)
    return o @ w_o


if __name__ == "__main__":
    # Small shapes consistent with Qwen2Attention semantics (TPU-friendly).
    T = 128               # tokens (flattened batch*seq)
    H = 256               # hidden_size
    num_heads = 4
    num_kv_heads = 2      # GQA
    head_dim = H // num_heads   # 64
    rope_theta = 10000.0

    key = jax.random.PRNGKey(0)
    kx, kq, kb, ko = jax.random.split(key, 4)

    x = jax.random.normal(kx, (T, H), dtype=jnp.float32)
    positions = jnp.arange(T, dtype=jnp.int32)

    qkv_out = (num_heads + 2 * num_kv_heads) * head_dim     # 512

    # PyTorch parameter layouts: qkv_proj.weight [qkv_out, H], o_proj.weight [H, nh*hd].
    w_qkv_pt = jax.random.normal(kq, (qkv_out, H), dtype=jnp.float32) * 0.05
    b_qkv = jax.random.normal(kb, (qkv_out,), dtype=jnp.float32) * 0.05
    w_o_pt = jax.random.normal(ko, (H, num_heads * head_dim), dtype=jnp.float32) * 0.05

    # Math-side (transposed) weights for the kernels.
    w_qkv = w_qkv_pt.T       # [H, qkv_out]
    w_o = w_o_pt.T           # [nh*hd, H]

    out = qwen2_attention(positions, x, w_qkv, b_qkv, w_o,
                          num_heads=num_heads, num_kv_heads=num_kv_heads,
                          head_dim=head_dim, rope_theta=rope_theta)
    out = jax.block_until_ready(out)

    ref = _reference(positions, x, w_qkv, b_qkv, w_o,
                     num_heads=num_heads, num_kv_heads=num_kv_heads,
                     head_dim=head_dim, rope_theta=rope_theta)

    assert out.shape == (T, H)
    err = float(jnp.max(jnp.abs(out - ref)))
    assert jnp.allclose(out, ref, atol=2e-2, rtol=2e-2), f"mismatch vs reference, max abs err={err}"

    print("KERNEL_OK")
</pallas_src>

<mosaic_0001>
module attributes {stable_mosaic.version = 11 : i64} {
  func.func @_linear_kernel(%arg0: i32, %arg1: i32, %arg2: i32, %arg3: memref<128x256xf32, #tpu.memory_space<vmem>>, %arg4: memref<256x512xf32, #tpu.memory_space<vmem>>, %arg5: memref<1x512xf32, #tpu.memory_space<vmem>>, %arg6: memref<128x512xf32, #tpu.memory_space<vmem>>, %arg7: memref<128x512xf32, #tpu.memory_space<vmem>>) attributes {dimension_semantics = [#tpu.dimension_semantics<parallel>, #tpu.dimension_semantics<parallel>, #tpu.dimension_semantics<arbitrary>], iteration_bounds = array<i64: 1, 1, 1>, scalar_prefetch = 0 : i64, scratch_operands = 1 : i64, tpu.core_type = #tpu.core_type<tc>, window_params = [{transform_indices = @transform_0, window_bounds = array<i64: 128, 256>}, {transform_indices = @transform_1, window_bounds = array<i64: 256, 512>}, {transform_indices = @transform_2, window_bounds = array<i64: 1, 512>}, {transform_indices = @transform_3, window_bounds = array<i64: 128, 512>}]} {
    %c0_i32 = arith.constant 0 : i32
    %0 = arith.cmpi eq, %arg2, %c0_i32 : i32
    %1 = arith.extui %0 : i1 to i32
    %c0_i32_0 = arith.constant 0 : i32
    %2 = arith.cmpi ne, %1, %c0_i32_0 : i32
    scf.if %2 {
      %cst_10 = arith.constant 0.000000e+00 : f32
      %12 = vector.broadcast %cst_10 : f32 to vector<128x512xf32>
      %c0_11 = arith.constant 0 : index
      %c0_12 = arith.constant 0 : index
      %13 = vector.load %arg7[%c0_11, %c0_12] : memref<128x512xf32, #tpu.memory_space<vmem>>, vector<128x512xf32>
      tpu.vector_store %arg7[%c0_11, %c0_12], %12 {strides = array<i32>} : memref<128x512xf32, #tpu.memory_space<vmem>>, vector<128x512xf32>,
    } else {
    }
    %c0 = arith.constant 0 : index
    %c0_1 = arith.constant 0 : index
    %3 = vector.load %arg7[%c0, %c0_1] : memref<128x512xf32, #tpu.memory_space<vmem>>, vector<128x512xf32>
    %c0_2 = arith.constant 0 : index
    %c0_3 = arith.constant 0 : index
    %4 = vector.load %arg3[%c0_2, %c0_3] : memref<128x256xf32, #tpu.memory_space<vmem>>, vector<128x256xf32>
    %c0_4 = arith.constant 0 : index
    %c0_5 = arith.constant 0 : index
    %5 = vector.load %arg4[%c0_4, %c0_5] : memref<256x512xf32, #tpu.memory_space<vmem>>, vector<256x512xf32>
    %cst = arith.constant dense<0.000000e+00> : vector<128x512xf32>
    %6 = tpu.matmul %4, %5, %cst {dimension_numbers = #tpu.dot_dimension_numbers<[1], [0], [0], [1], [0, 0, 1, 1], [], []>} : vector<128x256xf32>, vector<256x512xf32>, vector<128x512xf32> -> vector<128x512xf32>
    %7 = arith.addf %3, %6 : vector<128x512xf32>
    %c0_6 = arith.constant 0 : index
    %c0_7 = arith.constant 0 : index
    %8 = vector.load %arg7[%c0_6, %c0_7] : memref<128x512xf32, #tpu.memory_space<vmem>>, vector<128x512xf32>
    tpu.vector_store %arg7[%c0_6, %c0_7], %7 {strides = array<i32>} : memref<128x512xf32, #tpu.memory_space<vmem>>, vector<128x512xf32>,
    %c0_i32_8 = arith.constant 0 : i32
    %9 = arith.cmpi eq, %arg2, %c0_i32_8 : i32
    %10 = arith.extui %9 : i1 to i32
    %c0_i32_9 = arith.constant 0 : i32
    %11 = arith.cmpi ne, %10, %c0_i32_9 : i32
    scf.if %11 {
      %c0_10 = arith.constant 0 : index
      %c0_11 = arith.constant 0 : index
      %12 = vector.load %arg7[%c0_10, %c0_11] : memref<128x512xf32, #tpu.memory_space<vmem>>, vector<128x512xf32>
      %c0_12 = arith.constant 0 : index
      %c0_13 = arith.constant 0 : index
      %13 = vector.load %arg5[%c0_12, %c0_13] : memref<1x512xf32, #tpu.memory_space<vmem>>, vector<1x512xf32>
      %14 = vector.broadcast %13 : vector<1x512xf32> to vector<128x512xf32>
      %15 = arith.addf %12, %14 : vector<128x512xf32>
      %c0_14 = arith.constant 0 : index
      %c0_15 = arith.constant 0 : index
      %16 = vector.load %arg6[%c0_14, %c0_15] : memref<128x512xf32, #tpu.memory_space<vmem>>, vector<128x512xf32>
      tpu.vector_store %arg6[%c0_14, %c0_15], %15 {strides = array<i32>} : memref<128x512xf32, #tpu.memory_space<vmem>>, vector<128x512xf32>,
    } else {
    }
    return
  }
  func.func @transform_0(%arg0: i32, %arg1: i32, %arg2: i32) -> (i32, i32) {
    %c0_i32 = arith.constant 0 : i32
    return %arg0, %arg2 : i32, i32
  }
  func.func @transform_1(%arg0: i32, %arg1: i32, %arg2: i32) -> (i32, i32) {
    %c0_i32 = arith.constant 0 : i32
    return %arg2, %arg1 : i32, i32
  }
  func.func @transform_2(%arg0: i32, %arg1: i32, %arg2: i32) -> (i32, i32) {
    %c0_i32 = arith.constant 0 : i32
    %c0_i32_0 = arith.constant 0 : i32
    return %c0_i32, %arg1 : i32, i32
  }
  func.func @transform_3(%arg0: i32, %arg1: i32, %arg2: i32) -> (i32, i32) {
    %c0_i32 = arith.constant 0 : i32
    return %arg0, %arg1 : i32, i32
  }
}

</mosaic_0001>

<bundles_post_ra>
// kernel: tpu_custom_call.1
= control target key start
LH: loop header
LB: loop body
LE: loop exit
PB: predicated region body
PF: predicated region fallthrough
CT: control target
= control target key end

     0   :  { %8 = vsyncpa [#allocation4], 0  ;;  %s1371_s0 = inlined_call_operand.hbm [shape: f32[128,256], index: 0, kind: input, shape index: {}]   ;;  %s1372_s1 = inlined_call_operand.hbm [shape: f32[256,512], index: 1, kind: input, shape index: {}]   ;;  %s1373_s2 = inlined_call_operand.vmem [shape: f32[1,512], index: 2, kind: input, shape index: {}]   ;;  %s1374_s3 = inlined_call_operand.hbm [shape: f32[128,512], index: 3, kind: output, shape index: {}]  }
   0x1   :  { %9 = vsyncpa [#allocation7], 0 }
   0x2   :  { %10 = vsyncpa [#allocation5], 0  ;;  %s1227_s12 = smov [#allocation3]   ;;  %s1155_s16 = scalar_lea.hbm %s1371_s0, 4096 }
   0x3   :  { %s16_s13 = sshll.u32 %s1227_s12, 4  ;;  %p1156_p0 = scmp.ne.s32.totalorder %s1371_s0, %s1155_s16  ;;  %s17_s13 = int_to_ptr.vmem [resolvable:$true] %s16_s13 }
   0x4   :  { %p1159_p1 = scmp.lt.u32.totalorder %s1155_s16, %s1371_s0 }
   0x6   :  { %p1161_p2 = pnand %p1159_p1, %p1156_p0 }
   0x8   :  { %1164 = shalt.err (!%p1161_p2)
}
   0x9   :  { %s1165_s21 = scalar_lea.vmem %s17_s13, 4096  ;;  %p1170_p4 = scmp.lt.s32.totalorder %s17_s13, %s17_s13 }
   0xa   :  { %p1166_p3 = scmp.ne.s32.totalorder %s17_s13, %s1165_s21  ;;  %p1171_p5 = scmp.lt.s32.totalorder %s1165_s21, %s1165_s21 }
   0xc   :  { %p1172_p6 = por %p1171_p5, %p1170_p4 }
   0xe   :  { %p1173_p7 = pnand %p1172_p6, %p1166_p3 }
  0x10   :  { %1176 = shalt.err (!%p1173_p7)
}
  0x11   :  { %s1228_s22 = smov 256   ;;  %s1229_s23 = smov 16  }
  0x12   :  { %22 = dma.hbm_to_vmem [thread:$0]  %s1371_s0, 4096, %s17_s13, [#allocation4], %s1228_s22, %s1228_s22, %s1229_s23  }
  0x13   :  { %s1230_s26 = smov [#allocation6]   ;;  %s1177_s30 = scalar_lea.hbm %s1372_s1, 16384 }
  0x14   :  { %s28_s27 = sshll.u32 %s1230_s26, 4  ;;  %p1178_p8 = scmp.ne.s32.totalorder %s1372_s1, %s1177_s30  ;;  %s29_s27 = int_to_ptr.vmem [resolvable:$true] %s28_s27 }
  0x15   :  { %p1181_p9 = scmp.lt.u32.totalorder %s1177_s30, %s1372_s1 }
  0x17   :  { %p1183_p10 = pnand %p1181_p9, %p1178_p8 }
  0x19   :  { %1186 = shalt.err (!%p1183_p10)
}
  0x1a   :  { %s1187_s8 = scalar_lea.vmem %s29_s27, 16384  ;;  %p1192_p12 = scmp.lt.s32.totalorder %s29_s27, %s29_s27 }
  0x1b   :  { %p1188_p11 = scmp.ne.s32.totalorder %s29_s27, %s1187_s8  ;;  %p1193_p13 = scmp.lt.s32.totalorder %s1187_s8, %s1187_s8 }
  0x1d   :  { %p1194_p0 = por %p1193_p13, %p1192_p12 }
  0x1f   :  { %p1195_p1 = pnand %p1194_p0, %p1188_p11 }
  0x21   :  { %1198 = shalt.err (!%p1195_p1)
}
  0x22   :  { %s1231_s0 = smov 512   ;;  %s1232_s9 = smov 32  }
  0x23   :  { %34 = dma.hbm_to_vmem [thread:$0]  %s1372_s1, 16384, %s29_s27, [#allocation7], %s1231_s0, %s1231_s0, %s1232_s9  }
  0x24   :  { %1221 = dma.done.wait [#allocation4], 4096  }
  0x25   :  { %1222 = vsyncadd [#allocation4], 4294963200 }
  0x26   :  { %1223 = dma.done.wait [#allocation7], 16384  }
  0x27   :  { %1224 = vsyncadd [#allocation7], 4294950912  ;;  %v208_v0 = vld [vmem:[#allocation6 + $0x8] sm:$0xff]  ;;  %v210_v2 = vld [vmem:[#allocation6 + $0x18] sm:$0xff] }
  0x28   :  { %v212_v1 = vld [vmem:[#allocation6 + $0x28] sm:$0xff]  ;;  %v214_v4 = vld [vmem:[#allocation6 + $0x38] sm:$0xff]  ;;  %v207_v5 = vld [vmem:[#allocation6] sm:$0xff] }
  0x29   :  { %v1020_v3 = vpack.c.bf16 %v212_v1, %v208_v0  ;;  %v211_v6 = vld [vmem:[#allocation6 + $0x20] sm:$0xff]  ;;  %v1084_v7 = vpack.c.bf16 %v214_v4, %v210_v2  ;;  %v209_v9 = vld [vmem:[#allocation6 + $0x10] sm:$0xff]  ;;  %v216_v11 = vld [vmem:[#allocation6 + $0x48] sm:$0xff] }
  0x2a   :  { %v1022_v8 = vpack.c.bf16 %v211_v6, %v207_v5  ;;  %v213_v10 = vld [vmem:[#allocation6 + $0x30] sm:$0xff]  ;;  %v220_v13 = vld [vmem:[#allocation6 + $0x68] sm:$0xff]  ;;  %v218_v14 = vld [vmem:[#allocation6 + $0x58] sm:$0xff] }
  0x2b   :  { %1021 = vmatprep.subr.bf16.mxu0 %v1020_v3  ;;  %v1086_v12 = vpack.c.bf16 %v213_v10, %v209_v9  ;;  %v222_v15 = vld [vmem:[#allocation6 + $0x78] sm:$0xff]  ;;  %1085 = vmatprep.subr.bf16.mxu1 %v1084_v7  ;;  %v1024_v16 = vpack.c.bf16 %v220_v13, %v216_v11  ;;  %v215_v18 = vld [vmem:[#allocation6 + $0x40] sm:$0xff]  ;;  %v217_v20 = vld [vmem:[#allocation6 + $0x50] sm:$0xff] }
  0x2c   :  { %1023 = vmatpush1.bf16.msra.mxu0 %v1022_v8  ;;  %v1088_v17 = vpack.c.bf16 %v222_v15, %v218_v14  ;;  %v219_v19 = vld [vmem:[#allocation6 + $0x60] sm:$0xff]  ;;  %v221_v22 = vld [vmem:[#allocation6 + $0x70] sm:$0xff]  ;;  %v224_v23 = vld [vmem:[#allocation6 + $0x88] sm:$0xff] }
  0x2d   :  { %1087 = vmatpush1.bf16.msra.mxu1 %v1086_v12  ;;  %v1026_v21 = vpack.c.bf16 %v219_v19, %v215_v18  ;;  %v228_v24 = vld [vmem:[#allocation6 + $0xa8] sm:$0xff]  ;;  %1025 = vmatprep.subr.bf16.mxu0 %v1024_v16  ;;  %v1090_v25 = vpack.c.bf16 %v221_v22, %v217_v20  ;;  %v226_v27 = vld [vmem:[#allocation6 + $0x98] sm:$0xff]  ;;  %v223_v29 = vld [vmem:[#allocation6 + $0x80] sm:$0xff] }
  0x2e   :  { %1089 = vmatprep.subr.bf16.mxu1 %v1088_v17  ;;  %v1028_v26 = vpack.c.bf16 %v228_v24, %v224_v23  ;;  %v230_v28 = vld [vmem:[#allocation6 + $0xb8] sm:$0xff]  ;;  %v227_v31 = vld [vmem:[#allocation6 + $0xa0] sm:$0xff]  ;;  %v225_v32 = vld [vmem:[#allocation6 + $0x90] sm:$0xff] }
  0x2f   :  { %v1092_v30 = vpack.c.bf16 %v230_v28, %v226_v27  ;;  %v229_v33 = vld [vmem:[#allocation6 + $0xb0] sm:$0xff]  ;;  %v1030_v34 = vpack.c.bf16 %v227_v31, %v223_v29  ;;  %v232_v35 = vld [vmem:[#allocation6 + $0xc8] sm:$0xff]  ;;  %v234_v37 = vld [vmem:[#allocation6 + $0xd8] sm:$0xff] }
  0x30   :  { %1027 = vmatpush1.bf16.msra.mxu0 %v1026_v21  ;;  %v236_v36 = vld [vmem:[#allocation6 + $0xe8] sm:$0xff]  ;;  %v1094_v38 = vpack.c.bf16 %v229_v33, %v225_v32  ;;  %v238_v40 = vld [vmem:[#allocation6 + $0xf8] sm:$0xff]  ;;  %v231_v41 = vld [vmem:[#allocation6 + $0xc0] sm:$0xff] }
  0x31   :  { %1091 = vmatpush1.bf16.msra.mxu1 %v1090_v25  ;;  %1029 = vmatprep.subr.bf16.mxu0 %v1028_v26  ;;  %v1032_v39 = vpack.c.bf16 %v236_v36, %v232_v35  ;;  %v235_v42 = vld [vmem:[#allocation6 + $0xe0] sm:$0xff]  ;;  %v1096_v43 = vpack.c.bf16 %v238_v40, %v234_v37  ;;  %v233_v44 = vld [vmem:[#allocation6 + $0xd0] sm:$0xff]  ;;  %v240_v46 = vld [vmem:[#allocation6 + $0x108] sm:$0xff] }
  0x32   :  { %1093 = vmatprep.subr.bf16.mxu1 %v1092_v30  ;;  %v237_v45 = vld [vmem:[#allocation6 + $0xf0] sm:$0xff]  ;;  %v244_v47 = vld [vmem:[#allocation6 + $0x128] sm:$0xff]  ;;  %v242_v48 = vld [vmem:[#allocation6 + $0x118] sm:$0xff]  ;;  %v1034_v50 = vpack.c.bf16 %v235_v42, %v231_v41 }
  0x33   :  { %v246_v49 = vld [vmem:[#allocation6 + $0x138] sm:$0xff]  ;;  %v1098_v51 = vpack.c.bf16 %v237_v45, %v233_v44  ;;  %v1036_v52 = vpack.c.bf16 %v244_v47, %v240_v46  ;;  %v239_v53 = vld [vmem:[#allocation6 + $0x100] sm:$0xff]  ;;  %v241_v55 = vld [vmem:[#allocation6 + $0x110] sm:$0xff] }
  0x34   :  { %1031 = vmatpush1.bf16.msra.mxu0 %v1030_v34  ;;  %v243_v54 = vld [vmem:[#allocation6 + $0x120] sm:$0xff]  ;;  %v1100_v56 = vpack.c.bf16 %v246_v49, %v242_v48  ;;  %v245_v57 = vld [vmem:[#allocation6 + $0x130] sm:$0xff]  ;;  %v248_v58 = vld [vmem:[#allocation6 + $0x148] sm:$0xff] }
  0x35   :  { %1095 = vmatpush1.bf16.msra.mxu1 %v1094_v38  ;;  %1033 = vmatprep.subr.bf16.mxu0 %v1032_v39  ;;  %v252_v59 = vld [vmem:[#allocation6 + $0x168] sm:$0xff]  ;;  %v250_v60 = vld [vmem:[#allocation6 + $0x158] sm:$0xff]  ;;  %v1038_v62 = vpack.c.bf16 %v243_v54, %v239_v53  ;;  %v1102_v63 = vpack.c.bf16 %v245_v57, %v241_v55  ;;  %v247_v1 = vld [vmem:[#allocation6 + $0x140] sm:$0xff] }
  0x36   :  { %1097 = vmatprep.subr.bf16.mxu1 %v1096_v43  ;;  %v254_v61 = vld [vmem:[#allocation6 + $0x178] sm:$0xff]  ;;  %v1040_v0 = vpack.c.bf16 %v252_v59, %v248_v58  ;;  %v251_v2 = vld [vmem:[#allocation6 + $0x160] sm:$0xff]  ;;  %v249_v3 = vld [vmem:[#allocation6 + $0x150] sm:$0xff] }
  0x37   :  { %v1104_v4 = vpack.c.bf16 %v254_v61, %v250_v60  ;;  %v253_v5 = vld [vmem:[#allocation6 + $0x170] sm:$0xff]  ;;  %v256_v6 = vld [vmem:[#allocation6 + $0x188] sm:$0xff]  ;;  %v258_v8 = vld [vmem:[#allocation6 + $0x198] sm:$0xff]  ;;  %v1042_v10 = vpack.c.bf16 %v251_v2, %v247_v1 }
  0x38   :  { %1035 = vmatpush1.bf16.msra.mxu0 %v1034_v50  ;;  %v260_v7 = vld [vmem:[#allocation6 + $0x1a8] sm:$0xff]  ;;  %v262_v9 = vld [vmem:[#allocation6 + $0x1b8] sm:$0xff]  ;;  %v1106_v11 = vpack.c.bf16 %v253_v5, %v249_v3  ;;  %v255_v13 = vld [vmem:[#allocation6 + $0x180] sm:$0xff] }
  0x39   :  { %1099 = vmatpush1.bf16.msra.mxu1 %v1098_v51  ;;  %1037 = vmatprep.subr.bf16.mxu0 %v1036_v52  ;;  %v1044_v12 = vpack.c.bf16 %v260_v7, %v256_v6  ;;  %v259_v14 = vld [vmem:[#allocation6 + $0x1a0] sm:$0xff]  ;;  %v257_v15 = vld [vmem:[#allocation6 + $0x190] sm:$0xff]  ;;  %v1108_v16 = vpack.c.bf16 %v262_v9, %v258_v8  ;;  %v264_v18 = vld [vmem:[#allocation6 + $0x1c8] sm:$0xff] }
  0x3a   :  { %1101 = vmatprep.subr.bf16.mxu1 %v1100_v56  ;;  %v261_v17 = vld [vmem:[#allocation6 + $0x1b0] sm:$0xff]  ;;  %v268_v19 = vld [vmem:[#allocation6 + $0x1e8] sm:$0xff]  ;;  %v266_v20 = vld [vmem:[#allocation6 + $0x1d8] sm:$0xff]  ;;  %v1046_v22 = vpack.c.bf16 %v259_v14, %v255_v13 }
  0x3b   :  { %v270_v21 = vld [vmem:[#allocation6 + $0x1f8] sm:$0xff]  ;;  %v1110_v23 = vpack.c.bf16 %v261_v17, %v257_v15  ;;  %v1048_v24 = vpack.c.bf16 %v268_v19, %v264_v18  ;;  %v263_v25 = vld [vmem:[#allocation6 + $0x1c0] sm:$0xff]  ;;  %v265_v27 = vld [vmem:[#allocation6 + $0x1d0] sm:$0xff] }
  0x3c   :  { %1039 = vmatpush1.bf16.msra.mxu0 %v1038_v62  ;;  %v267_v26 = vld [vmem:[#allocation6 + $0x1e0] sm:$0xff]  ;;  %v1112_v28 = vpack.c.bf16 %v270_v21, %v266_v20  ;;  %v269_v29 = vld [vmem:[#allocation6 + $0x1f0] sm:$0xff]  ;;  %v272_v30 = vld [vmem:[#allocation6 + $0x208] sm:$0xff] }
  0x3d   :  { %1103 = vmatpush1.bf16.msra.mxu1 %v1102_v63  ;;  %1041 = vmatprep.subr.bf16.mxu0 %v1040_v0  ;;  %v276_v31 = vld [vmem:[#allocation6 + $0x228] sm:$0xff]  ;;  %v274_v32 = vld [vmem:[#allocation6 + $0x218] sm:$0xff]  ;;  %v1050_v34 = vpack.c.bf16 %v267_v26, %v263_v25  ;;  %v1114_v35 = vpack.c.bf16 %v269_v29, %v265_v27  ;;  %v271_v37 = vld [vmem:[#allocation6 + $0x200] sm:$0xff] }
  0x3e   :  { %1105 = vmatprep.subr.bf16.mxu1 %v1104_v4  ;;  %v278_v33 = vld [vmem:[#allocation6 + $0x238] sm:$0xff]  ;;  %v1052_v36 = vpack.c.bf16 %v276_v31, %v272_v30  ;;  %v275_v38 = vld [vmem:[#allocation6 + $0x220] sm:$0xff]  ;;  %v273_v39 = vld [vmem:[#allocation6 + $0x210] sm:$0xff] }
  0x3f   :  { %v1116_v40 = vpack.c.bf16 %v278_v33, %v274_v32  ;;  %v277_v41 = vld [vmem:[#allocation6 + $0x230] sm:$0xff]  ;;  %v280_v42 = vld [vmem:[#allocation6 + $0x248] sm:$0xff]  ;;  %v282_v44 = vld [vmem:[#allocation6 + $0x258] sm:$0xff]  ;;  %v1054_v46 = vpack.c.bf16 %v275_v38, %v271_v37 }
  0x40   :  { %1043 = vmatpush1.bf16.msra.mxu0 %v1042_v10  ;;  %v284_v43 = vld [vmem:[#allocation6 + $0x268] sm:$0xff]  ;;  %v286_v45 = vld [vmem:[#allocation6 + $0x278] sm:$0xff]  ;;  %v1118_v47 = vpack.c.bf16 %v277_v41, %v273_v39  ;;  %v279_v49 = vld [vmem:[#allocation6 + $0x240] sm:$0xff] }
  0x41   :  { %1107 = vmatpush1.bf16.msra.mxu1 %v1106_v11  ;;  %1045 = vmatprep.subr.bf16.mxu0 %v1044_v12  ;;  %v1056_v48 = vpack.c.bf16 %v284_v43, %v280_v42  ;;  %v283_v50 = vld [vmem:[#allocation6 + $0x260] sm:$0xff]  ;;  %v281_v51 = vld [vmem:[#allocation6 + $0x250] sm:$0xff]  ;;  %v1120_v52 = vpack.c.bf16 %v286_v45, %v282_v44  ;;  %v288_v54 = vld [vmem:[#allocation6 + $0x288] sm:$0xff] }
  0x42   :  { %1109 = vmatprep.subr.bf16.mxu1 %v1108_v16  ;;  %v285_v53 = vld [vmem:[#allocation6 + $0x270] sm:$0xff]  ;;  %v292_v55 = vld [vmem:[#allocation6 + $0x2a8] sm:$0xff]  ;;  %v290_v56 = vld [vmem:[#allocation6 + $0x298] sm:$0xff]  ;;  %v1058_v58 = vpack.c.bf16 %v283_v50, %v279_v49 }
  0x43   :  { %v294_v57 = vld [vmem:[#allocation6 + $0x2b8] sm:$0xff]  ;;  %v1122_v59 = vpack.c.bf16 %v285_v53, %v281_v51  ;;  %v1060_v60 = vpack.c.bf16 %v292_v55, %v288_v54  ;;  %v287_v61 = vld [vmem:[#allocation6 + $0x280] sm:$0xff]  ;;  %v289_v63 = vld [vmem:[#allocation6 + $0x290] sm:$0xff] }
  0x44   :  { %1047 = vmatpush1.bf16.msra.mxu0 %v1046_v22  ;;  %v291_v62 = vld [vmem:[#allocation6 + $0x2a0] sm:$0xff]  ;;  %v1124_v0 = vpack.c.bf16 %v294_v57, %v290_v56  ;;  %v293_v1 = vld [vmem:[#allocation6 + $0x2b0] sm:$0xff]  ;;  %v296_v2 = vld [vmem:[#allocation6 + $0x2c8] sm:$0xff] }
  0x45   :  { %1111 = vmatpush1.bf16.msra.mxu1 %v1110_v23  ;;  %1049 = vmatprep.subr.bf16.mxu0 %v1048_v24  ;;  %v300_v3 = vld [vmem:[#allocation6 + $0x2e8] sm:$0xff]  ;;  %v298_v4 = vld [vmem:[#allocation6 + $0x2d8] sm:$0xff]  ;;  %v1062_v6 = vpack.c.bf16 %v291_v62, %v287_v61  ;;  %v295_v7 = vld [vmem:[#allocation6 + $0x2c0] sm:$0xff]  ;;  %v1126_v8 = vpack.c.bf16 %v293_v1, %v289_v63 }
  0x46   :  { %1113 = vmatprep.subr.bf16.mxu1 %v1112_v28  ;;  %v302_v5 = vld [vmem:[#allocation6 + $0x2f8] sm:$0xff]  ;;  %v1064_v9 = vpack.c.bf16 %v300_v3, %v296_v2  ;;  %v299_v10 = vld [vmem:[#allocation6 + $0x2e0] sm:$0xff]  ;;  %v297_v11 = vld [vmem:[#allocation6 + $0x2d0] sm:$0xff] }
  0x47   :  { %v301_v12 = vld [vmem:[#allocation6 + $0x2f0] sm:$0xff]  ;;  %v1128_v13 = vpack.c.bf16 %v302_v5, %v298_v4  ;;  %v304_v14 = vld [vmem:[#allocation6 + $0x308] sm:$0xff]  ;;  %v306_v17 = vld [vmem:[#allocation6 + $0x318] sm:$0xff]  ;;  %v1066_v19 = vpack.c.bf16 %v299_v10, %v295_v7 }
  0x48   :  { %1051 = vmatpush1.bf16.msra.mxu0 %v1050_v34  ;;  %v308_v15 = vld [vmem:[#allocation6 + $0x328] sm:$0xff]  ;;  %v310_v18 = vld [vmem:[#allocation6 + $0x338] sm:$0xff]  ;;  %v1130_v20 = vpack.c.bf16 %v301_v12, %v297_v11  ;;  %v303_v22 = vld [vmem:[#allocation6 + $0x300] sm:$0xff] }
  0x49   :  { %1115 = vmatpush1.bf16.msra.mxu1 %v1114_v35  ;;  %1053 = vmatprep.subr.bf16.mxu0 %v1052_v36  ;;  %v176_v16 = vld [vmem:[#allocation3 + $0x8] sm:$0xff]  ;;  %v1068_v21 = vpack.c.bf16 %v308_v15, %v304_v14  ;;  %v307_v23 = vld [vmem:[#allocation6 + $0x320] sm:$0xff]  ;;  %v305_v24 = vld [vmem:[#allocation6 + $0x310] sm:$0xff]  ;;  %v1132_v25 = vpack.c.bf16 %v310_v18, %v306_v17 }
  0x4a   :  { %1117 = vmatprep.subr.bf16.mxu1 %v1116_v40  ;;  %399 = vmatprep.mubr.f32.mxu0 %v176_v16  ;;  %v309_v26 = vld [vmem:[#allocation6 + $0x330] sm:$0xff]  ;;  %v312_v27 = vld [vmem:[#allocation6 + $0x348] sm:$0xff]  ;;  %v314_v29 = vld [vmem:[#allocation6 + $0x358] sm:$0xff]  ;;  %v1070_v31 = vpack.c.bf16 %v307_v23, %v303_v22 }
  0x4b   :  { %560 = vmatprep.mubr.f32.mxu1 %v176_v16  ;;  %v316_v28 = vld [vmem:[#allocation6 + $0x368] sm:$0xff]  ;;  %v318_v30 = vld [vmem:[#allocation6 + $0x378] sm:$0xff]  ;;  %v1134_v32 = vpack.c.bf16 %v309_v26, %v305_v24  ;;  %v311_v34 = vld [vmem:[#allocation6 + $0x340] sm:$0xff] }
  0x4c   :  { %1055 = vmatpush1.bf16.msra.mxu0 %v1054_v46  ;;  %v1072_v33 = vpack.c.bf16 %v316_v28, %v312_v27  ;;  %v315_v35 = vld [vmem:[#allocation6 + $0x360] sm:$0xff]  ;;  %v313_v36 = vld [vmem:[#allocation6 + $0x350] sm:$0xff]  ;;  %v1136_v37 = vpack.c.bf16 %v318_v30, %v314_v29  ;;  %v320_v39 = vld [vmem:[#allocation6 + $0x388] sm:$0xff] }
  0x4d   :  { %1119 = vmatpush1.bf16.msra.mxu1 %v1118_v47  ;;  %1057 = vmatprep.subr.bf16.mxu0 %v1056_v48  ;;  %v317_v38 = vld [vmem:[#allocation6 + $0x370] sm:$0xff]  ;;  %v324_v40 = vld [vmem:[#allocation6 + $0x3a8] sm:$0xff]  ;;  %v322_v41 = vld [vmem:[#allocation6 + $0x398] sm:$0xff]  ;;  %v1074_v43 = vpack.c.bf16 %v315_v35, %v311_v34 }
  0x4e   :  { %1121 = vmatprep.subr.bf16.mxu1 %v1120_v52  ;;  %v326_v42 = vld [vmem:[#allocation6 + $0x3b8] sm:$0xff]  ;;  %v1138_v44 = vpack.c.bf16 %v317_v38, %v313_v36  ;;  %v1076_v45 = vpack.c.bf16 %v324_v40, %v320_v39  ;;  %v319_v46 = vld [vmem:[#allocation6 + $0x380] sm:$0xff]  ;;  %v321_v48 = vld [vmem:[#allocation6 + $0x390] sm:$0xff] }
  0x4f   :  { %v323_v47 = vld [vmem:[#allocation6 + $0x3a0] sm:$0xff]  ;;  %v1140_v49 = vpack.c.bf16 %v326_v42, %v322_v41  ;;  %v325_v50 = vld [vmem:[#allocation6 + $0x3b0] sm:$0xff]  ;;  %v328_v51 = vld [vmem:[#allocation6 + $0x3c8] sm:$0xff] }
  0x50   :  { %1059 = vmatpush1.bf16.msra.mxu0 %v1058_v58  ;;  %v332_v52 = vld [vmem:[#allocation6 + $0x3e8] sm:$0xff]  ;;  %v330_v53 = vld [vmem:[#allocation6 + $0x3d8] sm:$0xff]  ;;  %v1078_v55 = vpack.c.bf16 %v323_v47, %v319_v46  ;;  %v1142_v56 = vpack.c.bf16 %v325_v50, %v321_v48  ;;  %v327_v58 = vld [vmem:[#allocation6 + $0x3c0] sm:$0xff] }
  0x51   :  { %1123 = vmatpush1.bf16.msra.mxu1 %v1122_v59  ;;  %1061 = vmatprep.subr.bf16.mxu0 %v1060_v60  ;;  %v334_v54 = vld [vmem:[#allocation6 + $0x3f8] sm:$0xff]  ;;  %v1080_v57 = vpack.c.bf16 %v332_v52, %v328_v51  ;;  %v331_v59 = vld [vmem:[#allocation6 + $0x3e0] sm:$0xff]  ;;  %v329_v61 = vld [vmem:[#allocation6 + $0x3d0] sm:$0xff] }
  0x52   :  { %1125 = vmatprep.subr.bf16.mxu1 %v1124_v0  ;;  %v1144_v60 = vpack.c.bf16 %v334_v54, %v330_v53  ;;  %v333_v62 = vld [vmem:[#allocation6 + $0x3f0] sm:$0xff]  ;;  %v1082_v63 = vpack.c.bf16 %v331_v59, %v327_v58  ;;  %v175_v1 = vld [vmem:[#allocation3] sm:$0xff]  ;;  %v178_v2 = vld [vmem:[#allocation3 + $0x18] sm:$0xff] }
  0x53   :  { %v1146_v0 = vpack.c.bf16 %v333_v62, %v329_v61  ;;  %v177_v3 = vld [vmem:[#allocation3 + $0x10] sm:$0xff]  ;;  %v180_v4 = vld [vmem:[#allocation3 + $0x28] sm:$0xff]  ;;  %v179_v5 = vld [vmem:[#allocation3 + $0x20] sm:$0xff] }
  0x54   :  { %1063 = vmatpush1.bf16.msra.mxu0 %v1062_v6  ;;  %v182_v6 = vld [vmem:[#allocation3 + $0x38] sm:$0xff]  ;;  %v181_v7 = vld [vmem:[#allocation3 + $0x30] sm:$0xff]  ;;  %v188_v12 = vld [vmem:[#allocation3 + $0x68] sm:$0xff] }
  0x55   :  { %1127 = vmatpush1.bf16.msra.mxu1 %v1126_v8  ;;  %1065 = vmatprep.subr.bf16.mxu0 %v1064_v9  ;;  %v184_v8 = vld [vmem:[#allocation3 + $0x48] sm:$0xff]  ;;  %v183_v9 = vld [vmem:[#allocation3 + $0x40] sm:$0xff]  ;;  %v186_v10 = vld [vmem:[#allocation3 + $0x58] sm:$0xff] }
  0x56   :  { %1129 = vmatprep.subr.bf16.mxu1 %v1128_v13  ;;  %v185_v11 = vld [vmem:[#allocation3 + $0x50] sm:$0xff]  ;;  %v187_v13 = vld [vmem:[#allocation3 + $0x60] sm:$0xff]  ;;  %v190_v14 = vld [vmem:[#allocation3 + $0x78] sm:$0xff] }
  0x57   :  { %v189_v15 = vld [vmem:[#allocation3 + $0x70] sm:$0xff]  ;;  %v192_v16 = vld [vmem:[#allocation3 + $0x88] sm:$0xff]  ;;  %v191_v17 = vld [vmem:[#allocation3 + $0x80] sm:$0xff] }
  0x58   :  { %1067 = vmatpush1.bf16.msra.mxu0 %v1066_v19  ;;  %v194_v18 = vld [vmem:[#allocation3 + $0x98] sm:$0xff]  ;;  %v193_v19 = vld [vmem:[#allocation3 + $0x90] sm:$0xff]  ;;  %v200_v24 = vld [vmem:[#allocation3 + $0xc8] sm:$0xff] }
  0x59   :  { %1131 = vmatpush1.bf16.msra.mxu1 %v1130_v20  ;;  %1069 = vmatprep.subr.bf16.mxu0 %v1068_v21  ;;  %v196_v20 = vld [vmem:[#allocation3 + $0xa8] sm:$0xff]  ;;  %v195_v21 = vld [vmem:[#allocation3 + $0xa0] sm:$0xff]  ;;  %v198_v22 = vld [vmem:[#allocation3 + $0xb8] sm:$0xff] }
  0x5a   :  { %1133 = vmatprep.subr.bf16.mxu1 %v1132_v25  ;;  %v197_v23 = vld [vmem:[#allocation3 + $0xb0] sm:$0xff]  ;;  %v199_v25 = vld [vmem:[#allocation3 + $0xc0] sm:$0xff]  ;;  %v202_v26 = vld [vmem:[#allocation3 + $0xd8] sm:$0xff] }
  0x5b   :  { %v201_v27 = vld [vmem:[#allocation3 + $0xd0] sm:$0xff]  ;;  %v204_v28 = vld [vmem:[#allocation3 + $0xe8] sm:$0xff]  ;;  %v203_v29 = vld [vmem:[#allocation3 + $0xe0] sm:$0xff] }
  0x5c   :  { %1071 = vmatpush1.bf16.msra.mxu0 %v1070_v31  ;;  %v206_v30 = vld [vmem:[#allocation3 + $0xf8] sm:$0xff]  ;;  %v205_v31 = vld [vmem:[#allocation3 + $0xf0] sm:$0xff]  ;;  %v852_v35 = vld [vmem:[%s1373_s2] sm:$0xf]  ;;  %s1233_s2 = smov [#allocation8]  }
  0x5d   :  { %1135 = vmatpush1.bf16.msra.mxu1 %v1134_v32  ;;  %1073 = vmatprep.subr.bf16.mxu0 %v1072_v33  ;;  %v854_v32 = vlaneseq  ;;  %s1007_s13 = sshll.u32 %s1233_s2, 4  ;;  %s1008_s13 = int_to_ptr.vmem [resolvable:$true] %s1007_s13 }
  0x5e   :  { %1137 = vmatprep.subr.bf16.mxu1 %v1136_v37  ;;  %s1199_s14 = scalar_lea.vmem %s1008_s13, 8192  ;;  %p1204_p3 = scmp.lt.s32.totalorder %s1008_s13, %s1008_s13 }
  0x5f   :  { %v855_v33 = vshrl.u32 %v854_v32, 7  ;;  %p1200_p2 = scmp.ne.s32.totalorder %s1008_s13, %s1199_s14  ;;  %p1205_p4 = scmp.lt.s32.totalorder %s1199_s14, %s1199_s14 }
  0x60   :  { %1075 = vmatpush1.bf16.msra.mxu0 %v1074_v43 }
  0x61   :  { %1139 = vmatpush1.bf16.msra.mxu1 %v1138_v44  ;;  %1077 = vmatprep.subr.bf16.mxu0 %v1076_v45  ;;  %v856_v34 = vsub.s32 0, %v855_v33  ;;  %v864_v36 = vsub.s32 2, %v855_v33  ;;  %v860_v37 = vsub.s32 1, %v855_v33  ;;  %v868_v38 = vsub.s32 3, %v855_v33  ;;  %p1206_p5 = por %p1205_p4, %p1204_p3 }
  0x62   :  { %1141 = vmatprep.subr.bf16.mxu1 %v1140_v49 }
  0x63   :  { %v1284_v39 = vrot.slane %v852_v35, %v856_v34  ;;  %v1286_v40 = vrot.slane %v852_v35, %v864_v36  ;;  %v1288_v41 = vrot.slane %v852_v35, %v860_v37  ;;  %v1290_v42 = vrot.slane %v852_v35, %v868_v38  ;;  %p1207_p6 = pnand %p1206_p5, %p1200_p2 }
  0x64   :  { %1079 = vmatpush1.bf16.msra.mxu0 %v1078_v55 }
  0x65   :  { %1143 = vmatpush1.bf16.msra.mxu1 %v1142_v56  ;;  %1081 = vmatprep.subr.bf16.mxu0 %v1080_v57 }
  0x66   :  { %1145 = vmatprep.subr.bf16.mxu1 %v1144_v60 }
  0x68   :  { %1083 = vmatpush1.bf16.msra.mxu0 %v1082_v63 }
  0x69   :  { %1147 = vmatpush1.bf16.msra.mxu1 %v1146_v0 }
  0x6b   :  { %400 = vmatmul.mubr.f32.vlgmr.msra.gmra.mrb[0].mxu0 %v175_v1 }
  0x6c   :  { %561 = vmatmul.mubr.f32.vlgmr.msra.gmra.mrb[0].mxu1 %v175_v1  ;;  %405 = vmatprep.mubr.f32.mxu0 %v178_v2 }
  0x6d   :  { %566 = vmatprep.mubr.f32.mxu1 %v178_v2 }
  0x6f   :  { %406 = vmatmul.mubr.f32.gmra.mrb[2].mxu0 %v177_v3 }
  0x70   :  { %567 = vmatmul.mubr.f32.gmra.mrb[2].mxu1 %v177_v3  ;;  %411 = vmatprep.mubr.f32.mxu0 %v180_v4 }
  0x71   :  { %572 = vmatprep.mubr.f32.mxu1 %v180_v4 }
  0x73   :  { %412 = vmatmul.mubr.f32.gmra.mrb[4].mxu0 %v179_v5 }
  0x74   :  { %573 = vmatmul.mubr.f32.gmra.mrb[4].mxu1 %v179_v5  ;;  %417 = vmatprep.mubr.f32.mxu0 %v182_v6 }
  0x75   :  { %578 = vmatprep.mubr.f32.mxu1 %v182_v6 }
  0x77   :  { %418 = vmatmul.mubr.f32.gmra.mrb[6].mxu0 %v181_v7 }
  0x78   :  { %579 = vmatmul.mubr.f32.gmra.mrb[6].mxu1 %v181_v7  ;;  %423 = vmatprep.mubr.f32.mxu0 %v184_v8 }
  0x79   :  { %584 = vmatprep.mubr.f32.mxu1 %v184_v8 }
  0x7b   :  { %424 = vmatmul.mubr.f32.gmra.mrb[8].mxu0 %v183_v9 }
  0x7c   :  { %585 = vmatmul.mubr.f32.gmra.mrb[8].mxu1 %v183_v9  ;;  %429 = vmatprep.mubr.f32.mxu0 %v186_v10 }
  0x7d   :  { %590 = vmatprep.mubr.f32.mxu1 %v186_v10 }
  0x7f   :  { %430 = vmatmul.mubr.f32.gmra.mrb[10].mxu0 %v185_v11 }
  0x80   :  { %591 = vmatmul.mubr.f32.gmra.mrb[10].mxu1 %v185_v11  ;;  %435 = vmatprep.mubr.f32.mxu0 %v188_v12 }
  0x81   :  { %596 = vmatprep.mubr.f32.mxu1 %v188_v12 }
  0x83   :  { %436 = vmatmul.mubr.f32.gmra.mrb[12].mxu0 %v187_v13 }
  0x84   :  { %597 = vmatmul.mubr.f32.gmra.mrb[12].mxu1 %v187_v13  ;;  %441 = vmatprep.mubr.f32.mxu0 %v190_v14 }
  0x85   :  { %602 = vmatprep.mubr.f32.mxu1 %v190_v14 }
  0x87   :  { %442 = vmatmul.mubr.f32.gmra.mrb[14].mxu0 %v189_v15 }
  0x88   :  { %603 = vmatmul.mubr.f32.gmra.mrb[14].mxu1 %v189_v15  ;;  %447 = vmatprep.mubr.f32.mxu0 %v192_v16 }
  0x89   :  { %608 = vmatprep.mubr.f32.mxu1 %v192_v16 }
  0x8b   :  { %448 = vmatmul.mubr.f32.gmra.mrb[16].mxu0 %v191_v17 }
  0x8c   :  { %609 = vmatmul.mubr.f32.gmra.mrb[16].mxu1 %v191_v17  ;;  %453 = vmatprep.mubr.f32.mxu0 %v194_v18 }
  0x8d   :  { %614 = vmatprep.mubr.f32.mxu1 %v194_v18 }
  0x8f   :  { %454 = vmatmul.mubr.f32.gmra.mrb[18].mxu0 %v193_v19 }
  0x90   :  { %615 = vmatmul.mubr.f32.gmra.mrb[18].mxu1 %v193_v19  ;;  %459 = vmatprep.mubr.f32.mxu0 %v196_v20 }
  0x91   :  { %620 = vmatprep.mubr.f32.mxu1 %v196_v20 }
  0x93   :  { %460 = vmatmul.mubr.f32.gmra.mrb[20].mxu0 %v195_v21 }
  0x94   :  { %621 = vmatmul.mubr.f32.gmra.mrb[20].mxu1 %v195_v21  ;;  %465 = vmatprep.mubr.f32.mxu0 %v198_v22 }
  0x95   :  { %626 = vmatprep.mubr.f32.mxu1 %v198_v22 }
  0x97   :  { %466 = vmatmul.mubr.f32.gmra.mrb[22].mxu0 %v197_v23 }
  0x98   :  { %627 = vmatmul.mubr.f32.gmra.mrb[22].mxu1 %v197_v23  ;;  %471 = vmatprep.mubr.f32.mxu0 %v200_v24 }
  0x99   :  { %632 = vmatprep.mubr.f32.mxu1 %v200_v24 }
  0x9b   :  { %472 = vmatmul.mubr.f32.gmra.mrb[24].mxu0 %v199_v25 }
  0x9c   :  { %633 = vmatmul.mubr.f32.gmra.mrb[24].mxu1 %v199_v25  ;;  %477 = vmatprep.mubr.f32.mxu0 %v202_v26 }
  0x9d   :  { %638 = vmatprep.mubr.f32.mxu1 %v202_v26 }
  0x9f   :  { %478 = vmatmul.mubr.f32.gmra.mrb[26].mxu0 %v201_v27 }
  0xa0   :  { %639 = vmatmul.mubr.f32.gmra.mrb[26].mxu1 %v201_v27  ;;  %483 = vmatprep.mubr.f32.mxu0 %v204_v28 }
  0xa1   :  { %644 = vmatprep.mubr.f32.mxu1 %v204_v28 }
  0xa3   :  { %484 = vmatmul.mubr.f32.gmra.mrb[28].mxu0 %v203_v29 }
  0xa4   :  { %645 = vmatmul.mubr.f32.gmra.mrb[28].mxu1 %v203_v29  ;;  %489 = vmatprep.mubr.f32.mxu0 %v206_v30 }
  0xa5   :  { %650 = vmatprep.mubr.f32.mxu1 %v206_v30 }
  0xa7   :  { %490 = vmatmul.mubr.f32.gmra.mrb[30].mxu0 %v205_v31 }
  0xa8   :  { %651 = vmatmul.mubr.f32.gmra.mrb[30].mxu1 %v205_v31 }
 0x13e   :  { %v401_v43 = vpop.f32.mrb[0].mxu0 }
 0x13f   :  { %v874_v44 = vadd.f32 %v1284_v39, %v401_v43  ;;  %v562_v45 = vpop.f32.mrb[0].mxu1  ;;  %v403_v46 = vpop.f32.mrb[1].mxu0 }
 0x140   :  { %v876_v47 = vadd.f32 %v1286_v40, %v562_v45  ;;  %v875_v48 = vadd.f32 %v1288_v41, %v403_v46  ;;  %v564_v49 = vpop.f32.mrb[1].mxu1 }
 0x141   :  { %938 = vst [vmem:[#allocation8] sm:$0xff] %v874_v44  ;;  %v877_v50 = vadd.f32 %v1290_v42, %v564_v49 }
 0x142   :  { %940 = vst [vmem:[#allocation8 + $0x10] sm:$0xff] %v876_v47  ;;  %939 = vst [vmem:[#allocation8 + $0x8] sm:$0xff] %v875_v48  ;;  %v407_v51 = vpop.f32.mrb[2].mxu0 }
 0x143   :  { %941 = vst [vmem:[#allocation8 + $0x18] sm:$0xff] %v877_v50  ;;  %v878_v52 = vadd.f32 %v1284_v39, %v407_v51  ;;  %v568_v53 = vpop.f32.mrb[2].mxu1  ;;  %v409_v54 = vpop.f32.mrb[3].mxu0 }
 0x144   :  { %v880_v55 = vadd.f32 %v1286_v40, %v568_v53  ;;  %v879_v56 = vadd.f32 %v1288_v41, %v409_v54  ;;  %v570_v57 = vpop.f32.mrb[3].mxu1 }
 0x145   :  { %942 = vst [vmem:[#allocation8 + $0x20] sm:$0xff] %v878_v52  ;;  %v881_v58 = vadd.f32 %v1290_v42, %v570_v57 }
 0x146   :  { %944 = vst [vmem:[#allocation8 + $0x30] sm:$0xff] %v880_v55  ;;  %943 = vst [vmem:[#allocation8 + $0x28] sm:$0xff] %v879_v56  ;;  %v413_v59 = vpop.f32.mrb[4].mxu0 }
 0x147   :  { %945 = vst [vmem:[#allocation8 + $0x38] sm:$0xff] %v881_v58  ;;  %v882_v60 = vadd.f32 %v1284_v39, %v413_v59  ;;  %v574_v61 = vpop.f32.mrb[4].mxu1  ;;  %v415_v62 = vpop.f32.mrb[5].mxu0 }
 0x148   :  { %v884_v63 = vadd.f32 %v1286_v40, %v574_v61  ;;  %v883_v0 = vadd.f32 %v1288_v41, %v415_v62  ;;  %v576_v1 = vpop.f32.mrb[5].mxu1 }
 0x149   :  { %946 = vst [vmem:[#allocation8 + $0x40] sm:$0xff] %v882_v60  ;;  %v885_v2 = vadd.f32 %v1290_v42, %v576_v1 }
 0x14a   :  { %948 = vst [vmem:[#allocation8 + $0x50] sm:$0xff] %v884_v63  ;;  %947 = vst [vmem:[#allocation8 + $0x48] sm:$0xff] %v883_v0  ;;  %v419_v3 = vpop.f32.mrb[6].mxu0 }
 0x14b   :  { %949 = vst [vmem:[#allocation8 + $0x58] sm:$0xff] %v885_v2  ;;  %v886_v4 = vadd.f32 %v1284_v39, %v419_v3  ;;  %v580_v5 = vpop.f32.mrb[6].mxu1  ;;  %v421_v6 = vpop.f32.mrb[7].mxu0 }
 0x14c   :  { %v888_v7 = vadd.f32 %v1286_v40, %v580_v5  ;;  %v887_v8 = vadd.f32 %v1288_v41, %v421_v6  ;;  %v582_v9 = vpop.f32.mrb[7].mxu1 }
 0x14d   :  { %950 = vst [vmem:[#allocation8 + $0x60] sm:$0xff] %v886_v4  ;;  %v889_v10 = vadd.f32 %v1290_v42, %v582_v9 }
 0x14e   :  { %952 = vst [vmem:[#allocation8 + $0x70] sm:$0xff] %v888_v7  ;;  %951 = vst [vmem:[#allocation8 + $0x68] sm:$0xff] %v887_v8  ;;  %v425_v11 = vpop.f32.mrb[8].mxu0 }
 0x14f   :  { %953 = vst [vmem:[#allocation8 + $0x78] sm:$0xff] %v889_v10  ;;  %v890_v12 = vadd.f32 %v1284_v39, %v425_v11  ;;  %v586_v13 = vpop.f32.mrb[8].mxu1  ;;  %v427_v14 = vpop.f32.mrb[9].mxu0 }
 0x150   :  { %v892_v15 = vadd.f32 %v1286_v40, %v586_v13  ;;  %v891_v16 = vadd.f32 %v1288_v41, %v427_v14  ;;  %v588_v17 = vpop.f32.mrb[9].mxu1 }
 0x151   :  { %954 = vst [vmem:[#allocation8 + $0x80] sm:$0xff] %v890_v12  ;;  %v893_v18 = vadd.f32 %v1290_v42, %v588_v17 }
 0x152   :  { %956 = vst [vmem:[#allocation8 + $0x90] sm:$0xff] %v892_v15  ;;  %955 = vst [vmem:[#allocation8 + $0x88] sm:$0xff] %v891_v16  ;;  %v431_v19 = vpop.f32.mrb[10].mxu0 }
 0x153   :  { %957 = vst [vmem:[#allocation8 + $0x98] sm:$0xff] %v893_v18  ;;  %v894_v20 = vadd.f32 %v1284_v39, %v431_v19  ;;  %v592_v21 = vpop.f32.mrb[10].mxu1  ;;  %v433_v22 = vpop.f32.mrb[11].mxu0 }
 0x154   :  { %v896_v23 = vadd.f32 %v1286_v40, %v592_v21  ;;  %v895_v24 = vadd.f32 %v1288_v41, %v433_v22  ;;  %v594_v25 = vpop.f32.mrb[11].mxu1 }
 0x155   :  { %958 = vst [vmem:[#allocation8 + $0xa0] sm:$0xff] %v894_v20  ;;  %v897_v26 = vadd.f32 %v1290_v42, %v594_v25 }
 0x156   :  { %960 = vst [vmem:[#allocation8 + $0xb0] sm:$0xff] %v896_v23  ;;  %959 = vst [vmem:[#allocation8 + $0xa8] sm:$0xff] %v895_v24  ;;  %v437_v27 = vpop.f32.mrb[12].mxu0 }
 0x157   :  { %961 = vst [vmem:[#allocation8 + $0xb8] sm:$0xff] %v897_v26  ;;  %v898_v28 = vadd.f32 %v1284_v39, %v437_v27  ;;  %v598_v29 = vpop.f32.mrb[12].mxu1  ;;  %v439_v30 = vpop.f32.mrb[13].mxu0 }
 0x158   :  { %v900_v31 = vadd.f32 %v1286_v40, %v598_v29  ;;  %v899_v32 = vadd.f32 %v1288_v41, %v439_v30  ;;  %v600_v33 = vpop.f32.mrb[13].mxu1 }
 0x159   :  { %962 = vst [vmem:[#allocation8 + $0xc0] sm:$0xff] %v898_v28  ;;  %v901_v34 = vadd.f32 %v1290_v42, %v600_v33 }
 0x15a   :  { %964 = vst [vmem:[#allocation8 + $0xd0] sm:$0xff] %v900_v31  ;;  %963 = vst [vmem:[#allocation8 + $0xc8] sm:$0xff] %v899_v32  ;;  %v443_v35 = vpop.f32.mrb[14].mxu0 }
 0x15b   :  { %965 = vst [vmem:[#allocation8 + $0xd8] sm:$0xff] %v901_v34  ;;  %v902_v36 = vadd.f32 %v1284_v39, %v443_v35  ;;  %v604_v37 = vpop.f32.mrb[14].mxu1  ;;  %v445_v38 = vpop.f32.mrb[15].mxu0 }
 0x15c   :  { %v904_v43 = vadd.f32 %v1286_v40, %v604_v37  ;;  %v903_v44 = vadd.f32 %v1288_v41, %v445_v38  ;;  %v606_v45 = vpop.f32.mrb[15].mxu1 }
 0x15d   :  { %966 = vst [vmem:[#allocation8 + $0xe0] sm:$0xff] %v902_v36  ;;  %v905_v46 = vadd.f32 %v1290_v42, %v606_v45 }
 0x15e   :  { %968 = vst [vmem:[#allocation8 + $0xf0] sm:$0xff] %v904_v43  ;;  %967 = vst [vmem:[#allocation8 + $0xe8] sm:$0xff] %v903_v44  ;;  %v449_v47 = vpop.f32.mrb[16].mxu0 }
 0x15f   :  { %969 = vst [vmem:[#allocation8 + $0xf8] sm:$0xff] %v905_v46  ;;  %v906_v48 = vadd.f32 %v1284_v39, %v449_v47  ;;  %v610_v49 = vpop.f32.mrb[16].mxu1  ;;  %v451_v50 = vpop.f32.mrb[17].mxu0 }
 0x160   :  { %v908_v51 = vadd.f32 %v1286_v40, %v610_v49  ;;  %v907_v52 = vadd.f32 %v1288_v41, %v451_v50  ;;  %v612_v53 = vpop.f32.mrb[17].mxu1 }
 0x161   :  { %970 = vst [vmem:[#allocation8 + $0x100] sm:$0xff] %v906_v48  ;;  %v909_v54 = vadd.f32 %v1290_v42, %v612_v53 }
 0x162   :  { %972 = vst [vmem:[#allocation8 + $0x110] sm:$0xff] %v908_v51  ;;  %971 = vst [vmem:[#allocation8 + $0x108] sm:$0xff] %v907_v52  ;;  %v455_v55 = vpop.f32.mrb[18].mxu0 }
 0x163   :  { %973 = vst [vmem:[#allocation8 + $0x118] sm:$0xff] %v909_v54  ;;  %v910_v56 = vadd.f32 %v1284_v39, %v455_v55  ;;  %v616_v57 = vpop.f32.mrb[18].mxu1  ;;  %v457_v58 = vpop.f32.mrb[19].mxu0 }
 0x164   :  { %v912_v59 = vadd.f32 %v1286_v40, %v616_v57  ;;  %v911_v60 = vadd.f32 %v1288_v41, %v457_v58  ;;  %v618_v61 = vpop.f32.mrb[19].mxu1 }
 0x165   :  { %974 = vst [vmem:[#allocation8 + $0x120] sm:$0xff] %v910_v56  ;;  %v913_v62 = vadd.f32 %v1290_v42, %v618_v61 }
 0x166   :  { %976 = vst [vmem:[#allocation8 + $0x130] sm:$0xff] %v912_v59  ;;  %975 = vst [vmem:[#allocation8 + $0x128] sm:$0xff] %v911_v60  ;;  %v461_v63 = vpop.f32.mrb[20].mxu0 }
 0x167   :  { %977 = vst [vmem:[#allocation8 + $0x138] sm:$0xff] %v913_v62  ;;  %v914_v0 = vadd.f32 %v1284_v39, %v461_v63  ;;  %v622_v1 = vpop.f32.mrb[20].mxu1  ;;  %v463_v2 = vpop.f32.mrb[21].mxu0 }
 0x168   :  { %v916_v3 = vadd.f32 %v1286_v40, %v622_v1  ;;  %v915_v4 = vadd.f32 %v1288_v41, %v463_v2  ;;  %v624_v5 = vpop.f32.mrb[21].mxu1 }
 0x169   :  { %978 = vst [vmem:[#allocation8 + $0x140] sm:$0xff] %v914_v0  ;;  %v917_v6 = vadd.f32 %v1290_v42, %v624_v5 }
 0x16a   :  { %980 = vst [vmem:[#allocation8 + $0x150] sm:$0xff] %v916_v3  ;;  %979 = vst [vmem:[#allocation8 + $0x148] sm:$0xff] %v915_v4  ;;  %v467_v7 = vpop.f32.mrb[22].mxu0 }
 0x16b   :  { %981 = vst [vmem:[#allocation8 + $0x158] sm:$0xff] %v917_v6  ;;  %v918_v8 = vadd.f32 %v1284_v39, %v467_v7  ;;  %v628_v9 = vpop.f32.mrb[22].mxu1  ;;  %v469_v10 = vpop.f32.mrb[23].mxu0 }
 0x16c   :  { %v920_v11 = vadd.f32 %v1286_v40, %v628_v9  ;;  %v919_v12 = vadd.f32 %v1288_v41, %v469_v10  ;;  %v630_v13 = vpop.f32.mrb[23].mxu1 }
 0x16d   :  { %982 = vst [vmem:[#allocation8 + $0x160] sm:$0xff] %v918_v8  ;;  %v921_v14 = vadd.f32 %v1290_v42, %v630_v13 }
 0x16e   :  { %984 = vst [vmem:[#allocation8 + $0x170] sm:$0xff] %v920_v11  ;;  %983 = vst [vmem:[#allocation8 + $0x168] sm:$0xff] %v919_v12  ;;  %v473_v15 = vpop.f32.mrb[24].mxu0 }
 0x16f   :  { %985 = vst [vmem:[#allocation8 + $0x178] sm:$0xff] %v921_v14  ;;  %v922_v16 = vadd.f32 %v1284_v39, %v473_v15  ;;  %v634_v17 = vpop.f32.mrb[24].mxu1  ;;  %v475_v18 = vpop.f32.mrb[25].mxu0 }
 0x170   :  { %v924_v19 = vadd.f32 %v1286_v40, %v634_v17  ;;  %v923_v20 = vadd.f32 %v1288_v41, %v475_v18  ;;  %v636_v21 = vpop.f32.mrb[25].mxu1 }
 0x171   :  { %986 = vst [vmem:[#allocation8 + $0x180] sm:$0xff] %v922_v16  ;;  %v925_v22 = vadd.f32 %v1290_v42, %v636_v21 }
 0x172   :  { %988 = vst [vmem:[#allocation8 + $0x190] sm:$0xff] %v924_v19  ;;  %987 = vst [vmem:[#allocation8 + $0x188] sm:$0xff] %v923_v20  ;;  %v479_v23 = vpop.f32.mrb[26].mxu0 }
 0x173   :  { %989 = vst [vmem:[#allocation8 + $0x198] sm:$0xff] %v925_v22  ;;  %v926_v24 = vadd.f32 %v1284_v39, %v479_v23  ;;  %v640_v25 = vpop.f32.mrb[26].mxu1  ;;  %v481_v26 = vpop.f32.mrb[27].mxu0 }
 0x174   :  { %v928_v27 = vadd.f32 %v1286_v40, %v640_v25  ;;  %v927_v28 = vadd.f32 %v1288_v41, %v481_v26  ;;  %v642_v29 = vpop.f32.mrb[27].mxu1 }
 0x175   :  { %990 = vst [vmem:[#allocation8 + $0x1a0] sm:$0xff] %v926_v24  ;;  %v929_v30 = vadd.f32 %v1290_v42, %v642_v29 }
 0x176   :  { %992 = vst [vmem:[#allocation8 + $0x1b0] sm:$0xff] %v928_v27  ;;  %991 = vst [vmem:[#allocation8 + $0x1a8] sm:$0xff] %v927_v28  ;;  %v485_v31 = vpop.f32.mrb[28].mxu0 }
 0x177   :  { %993 = vst [vmem:[#allocation8 + $0x1b8] sm:$0xff] %v929_v30  ;;  %v930_v32 = vadd.f32 %v1284_v39, %v485_v31  ;;  %v646_v33 = vpop.f32.mrb[28].mxu1  ;;  %v487_v34 = vpop.f32.mrb[29].mxu0 }
 0x178   :  { %v932_v35 = vadd.f32 %v1286_v40, %v646_v33  ;;  %v931_v36 = vadd.f32 %v1288_v41, %v487_v34  ;;  %v648_v37 = vpop.f32.mrb[29].mxu1 }
 0x179   :  { %994 = vst [vmem:[#allocation8 + $0x1c0] sm:$0xff] %v930_v32  ;;  %v933_v38 = vadd.f32 %v1290_v42, %v648_v37 }
 0x17a   :  { %996 = vst [vmem:[#allocation8 + $0x1d0] sm:$0xff] %v932_v35  ;;  %995 = vst [vmem:[#allocation8 + $0x1c8] sm:$0xff] %v931_v36  ;;  %v491_v43 = vpop.f32.mrb[30].mxu0 }
 0x17b   :  { %997 = vst [vmem:[#allocation8 + $0x1d8] sm:$0xff] %v933_v38  ;;  %v934_v44 = vadd.f32 %v1284_v39, %v491_v43  ;;  %v652_v45 = vpop.f32.mrb[30].mxu1  ;;  %v493_v46 = vpop.f32.mrb[31].mxu0 }
 0x17c   :  { %v936_v47 = vadd.f32 %v1286_v40, %v652_v45  ;;  %v935_v48 = vadd.f32 %v1288_v41, %v493_v46  ;;  %v654_v49 = vpop.f32.mrb[31].mxu1 }
 0x17d   :  { %998 = vst [vmem:[#allocation8 + $0x1e0] sm:$0xff] %v934_v44  ;;  %v937_v50 = vadd.f32 %v1290_v42, %v654_v49 }
 0x17e   :  { %1000 = vst [vmem:[#allocation8 + $0x1f0] sm:$0xff] %v936_v47  ;;  %999 = vst [vmem:[#allocation8 + $0x1e8] sm:$0xff] %v935_v48 }
 0x17f   :  { %1001 = vst [vmem:[#allocation8 + $0x1f8] sm:$0xff] %v937_v50 }
 0x180   :  { %1210 = shalt.err (!%p1207_p6)
}
 0x181   :  { %s1211_s17 = scalar_lea.hbm %s1374_s3, 8192 }
 0x182   :  { %p1212_p7 = scmp.ne.s32.totalorder %s1374_s3, %s1211_s17  ;;  %p1215_p8 = scmp.lt.u32.totalorder %s1211_s17, %s1374_s3 }
 0x184   :  { %p1217_p9 = pnand %p1215_p8, %p1212_p7 }
 0x186   :  { %1220 = shalt.err (!%p1217_p9)
}
 0x187   :  { %1013 = dma.vmem_to_hbm [thread:$0]  %s1008_s13, 8192, %s1374_s3, [#allocation5], %s1231_s0, %s1231_s0, %s1232_s9  }
 0x188   :  { %1225 = dma.done.wait [#allocation5], 8192  }
 0x189   :  { %1226 = vsyncadd [#allocation5], 4294959104 }
 0x18a   :  { %1017 = vsyncpa [#allocation4], 1 }
 0x18b   :  { %1018 = vsyncpa [#allocation7], 1 }
 0x18c   :  { %1019 = vsyncpa [#allocation5], 1 }

</bundles_post_ra>
